<compile_context>
chip_gen: v7x
topology: tpu7x:2x2x1
jax: 0.10.0
libtpu: 0.0.40
codegen_flags: <defaults>
</compile_context>

<pallas_src>
import jax
import jax.numpy as jnp
from jax.experimental import pallas as pl
from jax.experimental.pallas import tpu as pltpu

STATE_SIZE = 5      # N
ACTION_SIZE = 5     # N
HIDDEN = 24

MAX_TILE_B = 8192            # per-step row tile cap (batch-on-lanes)
MIN_TILE_B = 128             # lane width
SMALL_BATCH_THRESHOLD = 64   # below this, plain jnp beats any kernel launch


def _round_up(x, m):
    return ((x + m - 1) // m) * m


def dqn_kernel(xT_ref, w1_ref, b1_ref, w2_ref, b2_ref, w3_ref, b3_ref, oT_ref):
    # Batch-on-lanes: xT is (5, tb), intermediates (24, tb), output (5, tb).
    # Weights are PyTorch-layout (out, in); biases are (out, 1) column vectors.
    xT = xT_ref[...]                                                  # (5, tb) f32
    h1 = jnp.dot(w1_ref[...], xT, preferred_element_type=jnp.float32)
    h1 = jnp.maximum(h1 + b1_ref[...], 0.0)                          # (24, tb)
    h2 = jnp.dot(w2_ref[...], h1, preferred_element_type=jnp.float32)
    h2 = jnp.maximum(h2 + b2_ref[...], 0.0)                          # (24, tb)
    h3 = jnp.dot(w3_ref[...], h2, preferred_element_type=jnp.float32)
    oT_ref[...] = jnp.maximum(h3 + b3_ref[...], 0.0)                 # (5, tb)


def _tiling(B):
    """Pick (num_tiles, tile_b, B_pad): lane-multiple tiles, even grid >= 2."""
    B_pad = _round_up(B, 2 * MIN_TILE_B)
    num_tiles = max(2, -(-B_pad // MAX_TILE_B))
    if num_tiles % 2:
        num_tiles += 1                       # keep grid even for v7x 2-TC sharding
    tile_b = _round_up(-(-B_pad // num_tiles), MIN_TILE_B)
    B_pad = num_tiles * tile_b
    return num_tiles, tile_b, B_pad


def _pallas_forward(xT, params, tile_b, num_tiles):
    B_pad = xT.shape[1]

    resident = lambda shape: pl.BlockSpec(shape, lambda i: (0, 0))

    flops = 2 * B_pad * (STATE_SIZE * HIDDEN + HIDDEN * HIDDEN + HIDDEN * ACTION_SIZE)
    bytes_accessed = (
        B_pad * STATE_SIZE * 4                    # x^T (f32)
        + B_pad * ACTION_SIZE * 4                 # out (f32)
        + (STATE_SIZE * HIDDEN + HIDDEN * HIDDEN + HIDDEN * ACTION_SIZE) * 4
        + (HIDDEN + HIDDEN + ACTION_SIZE) * 4     # biases (f32)
    )

    return pl.pallas_call(
        dqn_kernel,
        out_shape=jax.ShapeDtypeStruct((ACTION_SIZE, B_pad), jnp.float32),
        grid=(num_tiles,),
        in_specs=[
            pl.BlockSpec((STATE_SIZE, tile_b), lambda i: (0, i)),    # x^T tile
            resident((HIDDEN, STATE_SIZE)),                          # w1 (24, 5)
            resident((HIDDEN, 1)),                                   # b1 (24, 1)
            resident((HIDDEN, HIDDEN)),                              # w2 (24, 24)
            resident((HIDDEN, 1)),                                   # b2 (24, 1)
            resident((ACTION_SIZE, HIDDEN)),                         # w3 (5, 24)
            resident((ACTION_SIZE, 1)),                              # b3 (5, 1)
        ],
        out_specs=pl.BlockSpec((ACTION_SIZE, tile_b), lambda i: (0, i)),
        compiler_params=pltpu.CompilerParams(
            dimension_semantics=("parallel",),      # shard batch across v7x TCs
            vmem_limit_bytes=16 * 1024 * 1024,      # modest; <<64 MiB v7x VMEM
        ),
        cost_estimate=pl.CostEstimate(
            flops=flops, transcendentals=0, bytes_accessed=bytes_accessed),
    )(xT, params["w1"], params["b1"], params["w2"], params["b2"],
      params["w3"], params["b3"])


def dqnetwork_forward(x, params):
    """x: (B, state_size) float32.  params: dict of w1,b1,w2,b2,w3,b3
    (PyTorch layout: w (out, in), b stored as (out, 1)).

    Tiny batches (DQN action-selection path) use plain jnp — a Pallas launch
    is pure overhead there.  Large (replay/training) batches use the tiled
    batch-on-lanes Pallas kernel.
    """
    B = x.shape[0]
    if B < SMALL_BATCH_THRESHOLD:
        return reference_forward(x, params)

    num_tiles, tile_b, B_pad = _tiling(B)
    # Layout plumbing only: present a lane-dense (features, batch) slab.
    xT = jnp.pad(x.T, ((0, 0), (0, B_pad - B)))          # (5, B_pad)
    oT = _pallas_forward(xT, params, tile_b, num_tiles)  # (5, B_pad)
    # Padded columns produce relu(b) != 0; the slice below removes them — keep it.
    return oT[:, :B].T                                   # (B, 5)


def init_params(key):
    """Deterministic init matching PyTorch nn.Linear default:
    U(-1/sqrt(fan_in), 1/sqrt(fan_in)) for both weight and bias.
    Weights in PyTorch layout (out, in); biases as (out, 1) columns."""
    def linear(k, fan_in, fan_out):
        kw, kb = jax.random.split(k)
        bound = 1.0 / jnp.sqrt(jnp.float32(fan_in))
        w = jax.random.uniform(kw, (fan_out, fan_in), jnp.float32, -bound, bound)
        b = jax.random.uniform(kb, (fan_out, 1), jnp.float32, -bound, bound)
        return w, b

    k1, k2, k3 = jax.random.split(key, 3)
    w1, b1 = linear(k1, STATE_SIZE, HIDDEN)
    w2, b2 = linear(k2, HIDDEN, HIDDEN)
    w3, b3 = linear(k3, HIDDEN, ACTION_SIZE)
    return {"w1": w1, "b1": b1, "w2": w2, "b2": b2, "w3": w3, "b3": b3}


def reference_forward(x, p):
    h1 = jnp.maximum(x @ p["w1"].T + p["b1"].T, 0.0)
    h2 = jnp.maximum(h1 @ p["w2"].T + p["b2"].T, 0.0)
    return jnp.maximum(h2 @ p["w3"].T + p["b3"].T, 0.0)


if __name__ == "__main__":
    key = jax.random.PRNGKey(0)
    kp, kx_small, kx_big = jax.random.split(key, 3)
    params = init_params(kp)

    # 1) DQN action-selection path: batch 2 (state.unsqueeze(0)-style) — takes
    #    the plain-jnp fast path by design.
    x_small = jax.random.normal(kx_small, (2, STATE_SIZE), jnp.float32)
    out_small = jax.block_until_ready(dqnetwork_forward(x_small, params))
    ref_small = reference_forward(x_small, params)
    assert out_small.shape == (2, ACTION_SIZE)
    assert jnp.allclose(out_small, ref_small, atol=1e-5, rtol=1e-5)

    # 2) Replay/training-batch path: exercises the tiled batch-on-lanes Pallas
    #    kernel (even grid, lane-dense blocks, f32 end to end) including
    #    batch padding + slice-off (1000 -> 1024 padded).
    big_batch = 1000
    x_big = jax.random.normal(kx_big, (big_batch, STATE_SIZE), jnp.float32)
    out_big = jax.block_until_ready(dqnetwork_forward(x_big, params))
    ref_big = reference_forward(x_big, params)
    assert out_big.shape == (big_batch, ACTION_SIZE)
    # Full-f32 path -> tight tolerance vs. the f32 reference.
    assert jnp.allclose(out_big, ref_big, atol=1e-4, rtol=1e-4), \
        "mismatch vs reference"

    print("KERNEL_OK")
</pallas_src>

<mosaic_0001>
module attributes {stable_mosaic.version = 11 : i64} {
  func.func @dqn_kernel(%arg0: i32, %arg1: memref<5x512xf32, #tpu.memory_space<vmem>>, %arg2: memref<24x5xf32, #tpu.memory_space<vmem>>, %arg3: memref<24x1xf32, #tpu.memory_space<vmem>>, %arg4: memref<24x24xf32, #tpu.memory_space<vmem>>, %arg5: memref<24x1xf32, #tpu.memory_space<vmem>>, %arg6: memref<5x24xf32, #tpu.memory_space<vmem>>, %arg7: memref<5x1xf32, #tpu.memory_space<vmem>>, %arg8: memref<5x512xf32, #tpu.memory_space<vmem>>) attributes {dimension_semantics = [#tpu.dimension_semantics<parallel>], iteration_bounds = array<i64: 2>, scalar_prefetch = 0 : i64, scratch_operands = 0 : i64, tpu.core_type = #tpu.core_type<tc>, window_params = [{transform_indices = @transform_0, window_bounds = array<i64: 5, 512>}, {pipeline_mode = #tpu.pipeline_mode<synchronous>, transform_indices = @transform_1, window_bounds = array<i64: 24, 5>}, {pipeline_mode = #tpu.pipeline_mode<synchronous>, transform_indices = @transform_2, window_bounds = array<i64: 24, 1>}, {pipeline_mode = #tpu.pipeline_mode<synchronous>, transform_indices = @transform_3, window_bounds = array<i64: 24, 24>}, {pipeline_mode = #tpu.pipeline_mode<synchronous>, transform_indices = @transform_4, window_bounds = array<i64: 24, 1>}, {pipeline_mode = #tpu.pipeline_mode<synchronous>, transform_indices = @transform_5, window_bounds = array<i64: 5, 24>}, {pipeline_mode = #tpu.pipeline_mode<synchronous>, transform_indices = @transform_6, window_bounds = array<i64: 5, 1>}, {transform_indices = @transform_7, window_bounds = array<i64: 5, 512>}]} {
    %c0 = arith.constant 0 : index
    %c0_0 = arith.constant 0 : index
    %0 = vector.load %arg1[%c0, %c0_0] : memref<5x512xf32, #tpu.memory_space<vmem>>, vector<5x512xf32>
    %c0_1 = arith.constant 0 : index
    %c0_2 = arith.constant 0 : index
    %1 = vector.load %arg2[%c0_1, %c0_2] : memref<24x5xf32, #tpu.memory_space<vmem>>, vector<24x5xf32>
    %cst = arith.constant dense<0.000000e+00> : vector<24x512xf32>
    %2 = tpu.matmul %1, %0, %cst {dimension_numbers = #tpu.dot_dimension_numbers<[1], [0], [0], [1], [0, 0, 1, 1], [], []>} : vector<24x5xf32>, vector<5x512xf32>, vector<24x512xf32> -> vector<24x512xf32>
    %c0_3 = arith.constant 0 : index
    %c0_4 = arith.constant 0 : index
    %3 = vector.load %arg3[%c0_3, %c0_4] : memref<24x1xf32, #tpu.memory_space<vmem>>, vector<24x1xf32>
    %4 = vector.broadcast %3 : vector<24x1xf32> to vector<24x512xf32>
    %5 = arith.addf %2, %4 : vector<24x512xf32>
    %cst_5 = arith.constant 0.000000e+00 : f32
    %6 = vector.broadcast %cst_5 : f32 to vector<24x512xf32>
    %7 = arith.maximumf %5, %6 : vector<24x512xf32>
    %c0_6 = arith.constant 0 : index
    %c0_7 = arith.constant 0 : index
    %8 = vector.load %arg4[%c0_6, %c0_7] : memref<24x24xf32, #tpu.memory_space<vmem>>, vector<24x24xf32>
    %cst_8 = arith.constant dense<0.000000e+00> : vector<24x512xf32>
    %9 = tpu.matmul %8, %7, %cst_8 {dimension_numbers = #tpu.dot_dimension_numbers<[1], [0], [0], [1], [0, 0, 1, 1], [], []>} : vector<24x24xf32>, vector<24x512xf32>, vector<24x512xf32> -> vector<24x512xf32>
    %c0_9 = arith.constant 0 : index
    %c0_10 = arith.constant 0 : index
    %10 = vector.load %arg5[%c0_9, %c0_10] : memref<24x1xf32, #tpu.memory_space<vmem>>, vector<24x1xf32>
    %11 = vector.broadcast %10 : vector<24x1xf32> to vector<24x512xf32>
    %12 = arith.addf %9, %11 : vector<24x512xf32>
    %cst_11 = arith.constant 0.000000e+00 : f32
    %13 = vector.broadcast %cst_11 : f32 to vector<24x512xf32>
    %14 = arith.maximumf %12, %13 : vector<24x512xf32>
    %c0_12 = arith.constant 0 : index
    %c0_13 = arith.constant 0 : index
    %15 = vector.load %arg6[%c0_12, %c0_13] : memref<5x24xf32, #tpu.memory_space<vmem>>, vector<5x24xf32>
    %cst_14 = arith.constant dense<0.000000e+00> : vector<5x512xf32>
    %16 = tpu.matmul %15, %14, %cst_14 {dimension_numbers = #tpu.dot_dimension_numbers<[1], [0], [0], [1], [0, 0, 1, 1], [], []>} : vector<5x24xf32>, vector<24x512xf32>, vector<5x512xf32> -> vector<5x512xf32>
    %c0_15 = arith.constant 0 : index
    %c0_16 = arith.constant 0 : index
    %17 = vector.load %arg7[%c0_15, %c0_16] : memref<5x1xf32, #tpu.memory_space<vmem>>, vector<5x1xf32>
    %18 = vector.broadcast %17 : vector<5x1xf32> to vector<5x512xf32>
    %19 = arith.addf %16, %18 : vector<5x512xf32>
    %cst_17 = arith.constant 0.000000e+00 : f32
    %20 = vector.broadcast %cst_17 : f32 to vector<5x512xf32>
    %21 = arith.maximumf %19, %20 : vector<5x512xf32>
    %c0_18 = arith.constant 0 : index
    %c0_19 = arith.constant 0 : index
    %22 = vector.load %arg8[%c0_18, %c0_19] : memref<5x512xf32, #tpu.memory_space<vmem>>, vector<5x512xf32>
    tpu.vector_store %arg8[%c0_18, %c0_19], %21 {strides = array<i32>} : memref<5x512xf32, #tpu.memory_space<vmem>>, vector<5x512xf32>,
    return
  }
  func.func @transform_0(%arg0: i32) -> (i32, i32) {
    %c0_i32 = arith.constant 0 : i32
    %c0_i32_0 = arith.constant 0 : i32
    return %c0_i32, %arg0 : i32, i32
  }
  func.func @transform_1(%arg0: i32) -> (i32, i32) {
    %c0_i32 = arith.constant 0 : i32
    %c0_i32_0 = arith.constant 0 : i32
    %c0_i32_1 = arith.constant 0 : i32
    return %c0_i32, %c0_i32_0 : i32, i32
  }
  func.func @transform_2(%arg0: i32) -> (i32, i32) {
    %c0_i32 = arith.constant 0 : i32
    %c0_i32_0 = arith.constant 0 : i32
    %c0_i32_1 = arith.constant 0 : i32
    return %c0_i32, %c0_i32_0 : i32, i32
  }
  func.func @transform_3(%arg0: i32) -> (i32, i32) {
    %c0_i32 = arith.constant 0 : i32
    %c0_i32_0 = arith.constant 0 : i32
    %c0_i32_1 = arith.constant 0 : i32
    return %c0_i32, %c0_i32_0 : i32, i32
  }
  func.func @transform_4(%arg0: i32) -> (i32, i32) {
    %c0_i32 = arith.constant 0 : i32
    %c0_i32_0 = arith.constant 0 : i32
    %c0_i32_1 = arith.constant 0 : i32
    return %c0_i32, %c0_i32_0 : i32, i32
  }
  func.func @transform_5(%arg0: i32) -> (i32, i32) {
    %c0_i32 = arith.constant 0 : i32
    %c0_i32_0 = arith.constant 0 : i32
    %c0_i32_1 = arith.constant 0 : i32
    return %c0_i32, %c0_i32_0 : i32, i32
  }
  func.func @transform_6(%arg0: i32) -> (i32, i32) {
    %c0_i32 = arith.constant 0 : i32
    %c0_i32_0 = arith.constant 0 : i32
    %c0_i32_1 = arith.constant 0 : i32
    return %c0_i32, %c0_i32_0 : i32, i32
  }
  func.func @transform_7(%arg0: i32) -> (i32, i32) {
    %c0_i32 = arith.constant 0 : i32
    %c0_i32_0 = arith.constant 0 : i32
    return %c0_i32, %arg0 : i32, i32
  }
}

</mosaic_0001>

<bundles_post_ra>
// kernel: tpu_custom_call.1
= control target key start
LH: loop header
LB: loop body
LE: loop exit
PB: predicated region body
PF: predicated region fallthrough
CT: control target
= control target key end

     0   :  { %12 = vsyncpa [#allocation3], 0  ;;  %s1315_s0 = inlined_call_operand.vmem [shape: f32[5,1024], index: 0, kind: input, shape index: {}]   ;;  %s1316_s1 = inlined_call_operand.vmem [shape: f32[24,5], index: 1, kind: input, shape index: {}]   ;;  %s1317_s2 = inlined_call_operand.vmem [shape: f32[24,1], index: 2, kind: input, shape index: {}]   ;;  %s1318_s3 = inlined_call_operand.vmem [shape: f32[24,24], index: 3, kind: input, shape index: {}]   ;;  %s1319_s4 = inlined_call_operand.vmem [shape: f32[24,1], index: 4, kind: input, shape index: {}]   ;;  %s1320_s5 = inlined_call_operand.vmem [shape: f32[5,24], index: 5, kind: input, shape index: {}]   ;;  %s1321_s6 = inlined_call_operand.vmem [shape: f32[5,1], index: 6, kind: input, shape index: {}]   ;;  %s1322_s7 = inlined_call_operand.hbm [shape: f32[5,1024], index: 7, kind: output, shape index: {}]  }
   0x1   :  { %14 = vsyncpa [#allocation3 + $0x1], 0  ;;  %s1146_s24 = smov 0   ;;  %s1148_s25 = smov 0  }
   0x2   :  { %s1150_s26 = smov 0   ;;  %s1152_s27 = smov 0  }
   0x3 LB: > { %s1167_s28 = sadd.s32 4294967295, %s1101_s27   ;;  %s949_s29 = sadd.s32 4294967294, %s1101_s27   ;;  %s1101_s27 = sphi %s1152_s27, %s1328_s27   ;;  %s1097_s26 = sphi %s1150_s26, %s1327_s26   ;;  %s1093_s25 = sphi %s1148_s25, %s1326_s25   ;;  %s1089_s24 = sphi %s1146_s24, %s1325_s24  }
   0x4   : > { %s1171_s30 = sadd.s32 1, %s1101_s27   ;;  %s179_s8 = sadd.s32 1, %s1097_s26 }
   0x5   : > { %s176_s9 = ssub.s32 %s1101_s27, %s1171_s30  ;;  %p189_p0 = scmp.ne.s32.totalorder %s1097_s26, %s1093_s25 }
   0x6   : > { %p177_p1 = scmp.eq.s32.totalorder %s176_s9, 0  ;;  %p190_p2 = scmp.eq.s32.totalorder %s1167_s28, 1 }
   0x7   : > { %p195_p3 = scmp.ne.s32.totalorder %s1093_s25, %s1089_s24  ;;  %p196_p4 = scmp.eq.s32.totalorder %s949_s29, 1 }
   0x8   : > { %s1182_s10 = scalar_select %p177_p1, %s1097_s26, %s179_s8  }
   0x9   : > { %p1184_p5 = por %p190_p2, %p189_p0  ;;  %p1188_p6 = por %p196_p4, %p195_p3 }
   0xa   : > { %p952_p7 = scmp.ge.s32.totalorder %s1101_s27, 1  ;;  %p241_p8 = scmp.lt.s32.totalorder %s1101_s27, 3 }
   0xc   : > { %p242_p9 = pnand %p952_p7, %p241_p8 }
   0xd   : > { %s954_s13 = sshll.u32 (!%p242_p9), %s1167_s28, 2  ;;  %v1103_v0 = vmov (!%p242_p9), 0.0   ;;  %v287_v1 = vld [vmem:[%s1317_s2] sm:$0xff] (!%p242_p9)  ;;  %v1104_v2 = vmov (!%p242_p9), 0   ;;  %v289_v3 = vld [vmem:[%s1317_s2 + $0x10] sm:$0xff] (!%p242_p9)  ;;  %v288_v4 = vld [vmem:[%s1317_s2 + $0x8] sm:$0xff] (!%p242_p9) }
   0xe   : > { %245 = sbr.rel (%p242_p9) target bundleno = 716 (0x2cc), region = 48  ;;  %p274_p10 = scmp.lt.s32.totalorder (!%p242_p9), %s954_s13, 7  ;;  %392 = vmatprep.mubr.f32.mxu0 (!%p242_p9), %v1103_v0  ;;  %475 = vmatprep.mubr.f32.mxu1 (!%p242_p9), %v1103_v0  ;;  %v509_v5 = vld [vmem:[%s1319_s4] sm:$0xff] (!%p242_p9)  ;;  %vm315_vm0 = vcmask (!%p242_p9), 1044480   ;;  %vm305_vm1 = vcmask (!%p242_p9), 39936   ;;  %v510_v11 = vld [vmem:[%s1319_s4 + $0x8] sm:$0xff] (!%p242_p9) }
   0xf   : > { %1037 = vset.pattern.permute.xlu0 (!%p242_p9), %v1104_v2  ;;  %1038 = vset.pattern.permute.xlu1 (!%p242_p9), %v1104_v2  ;;  %v284_v6 = vld [vmem:[%s1316_s1] sm:$0xff] (!%p242_p9)  ;;  %v511_v12 = vld [vmem:[%s1319_s4 + $0x10] sm:$0xff] (!%p242_p9)  ;;  %v285_v13 = vld [vmem:[%s1316_s1 + $0x8] sm:$0xff] (!%p242_p9)  ;;  %vm527_vm2 = vcmask (!%p242_p9), 195584   ;;  %s270_s18 = sand.u32 (!%p242_p9), 1, %s1093_s25   ;;  %s979_s20 = sshll.u32 (!%p242_p9), %s1167_s28, 9 }
  0x10   : > { %292 = vperm.xlu0 (!%p242_p9), %1037, %v287_v1   ;;  %302 = vperm.xlu1 (!%p242_p9), %1038, %v289_v3   ;;  %v716_v14 = vld [vmem:[%s1321_s6] sm:$0x1f] (!%p242_p9)  ;;  %v286_v15 = vld [vmem:[%s1316_s1 + $0x10] sm:$0xff] (!%p242_p9)  ;;  %v507_v60 = vld [vmem:[%s1318_s3 + $0x8] sm:$0xff] (!%p242_p9)  ;;  %s953_s19 = sshll.u32 (!%p242_p9), %s270_s18, 5  ;;  %s876_s28 = scalar_lea.sflag (!%p242_p9), [#allocation3], %s270_s18 }
  0x11   : > { %v506_v59 = vld [vmem:[%s1318_s3] sm:$0xff] (!%p242_p9)  ;;  %v508_v61 = vld [vmem:[%s1318_s3 + $0x10] sm:$0xff] (!%p242_p9)  ;;  %s272_s21 = scalar_lea.vmem (!%p242_p9), [#allocation2], %s953_s19  ;;  %s1105_s14 = smov (!%p242_p9), [#allocation2]  }
  0x14   : > { %297 = vperm.xlu0 (!%p242_p9), %1037, %v288_v4   ;;  %514 = vperm.xlu1 (!%p242_p9), %1038, %v509_v5  }
  0x15   : > { %s1330_s13 = smov (!%p274_p10, %s954_s13), 7 }
  0x16   : > { %s955_s22 = sshll.u32 %s1330_s13, 3  ;;  %s1043_s13 = sshll.u32 %s1105_s14, 4  ;;  %s1044_s13 = int_to_ptr.vmem [resolvable:$false] %s1043_s13 }
  0x17   : > { %s277_s8 = scalar_lea.vmem %s1315_s0, %s955_s22  ;;  %s890_s22 = sshll.u32 %s272_s21, 4  ;;  %s1275_s22 = int_to_ptr.vmem [resolvable:$true] %s890_s22 }
  0x18   : > { %v281_v7 = vld [vmem:[%s277_s8 + $0x8] sm:$0x1f]  ;;  %v283_v8 = vld [vmem:[%s277_s8 + $0x18] sm:$0x1f]  ;;  %v280_v9 = vld [vmem:[%s277_s8] sm:$0x1f]  ;;  %519 = vperm.xlu0 %1037, %v510_v11   ;;  %524 = vperm.xlu1 %1038, %v511_v12   ;;  %p1046_p0 = scmp.lt.s32.totalorder %s1275_s22, %s1044_s13 }
  0x19   : > { %956 = vmatprep.subr.msk.mxu0 %vm315_vm0, %v281_v7  ;;  %961 = vmatprep.subr.msk.mxu1 %vm315_vm0, %v283_v8  ;;  %v282_v10 = vld [vmem:[%s277_s8 + $0x10] sm:$0x1f]  ;;  %s1273_s8 = scalar_lea.hbm %s1322_s7, %s979_s20  ;;  %s1039_s9 = scalar_lea.vmem %s1275_s22, 512 }
  0x1a   : > { %957 = vmatpush1.msk.msra.mxu0 %vm315_vm0, %v280_v9  ;;  %962 = vmatpush1.msk.msra.mxu1 %vm315_vm0, %v282_v10  ;;  %p1040_p11 = scmp.ne.s32.totalorder %s1275_s22, %s1039_s9  ;;  %s1045_s15 = scalar_lea.vmem %s1044_s13, 1024 }
  0x1b   : > { %958 = vmatmul.mubr.msk.f32.vlgmr.msra.gmra.mrb[0].mxu0 %vm305_vm1, %v284_v6  ;;  %963 = vmatmul.mubr.msk.f32.vlgmr.msra.gmra.mrb[0].mxu1 %vm305_vm1, %v284_v6  ;;  %p1047_p1 = scmp.lt.s32.totalorder %s1045_s15, %s1039_s9 }
  0x1c   : > { %398 = vmatprep.mubr.f32.mxu0 %v1103_v0  ;;  %481 = vmatprep.mubr.f32.mxu1 %v1103_v0  ;;  %p1041_p12 = pnand %p1040_p11, %p1184_p5 }
  0x1d   : > { %719 = vperm.xlu0 %1037, %v716_v14   ;;  %p1048_p2 = por %p1047_p1, %p1046_p0 }
  0x1e   : > { %p1042_p13 = pneg %p1041_p12 }
  0x1f   : > { %959 = vmatmul.mubr.msk.f32.gmra.mrb[2].mxu0 %vm305_vm1, %v285_v13  ;;  %964 = vmatmul.mubr.msk.f32.gmra.mrb[2].mxu1 %vm305_vm1, %v285_v13 }
  0x20   : > { %404 = vmatprep.mubr.f32.mxu0 %v1103_v0  ;;  %487 = vmatprep.mubr.f32.mxu1 %v1103_v0  ;;  %p1049_p3 = pnand %p1048_p2, %p1042_p13 }
  0x23   : > { %960 = vmatmul.mubr.msk.f32.gmra.mrb[4].mxu0 %vm305_vm1, %v286_v15  ;;  %965 = vmatmul.mubr.msk.f32.gmra.mrb[4].mxu1 %vm305_vm1, %v286_v15 }
  0x24   : > { %601 = vmatprep.mubr.f32.mxu0 %v1103_v0  ;;  %684 = vmatprep.mubr.f32.mxu1 %v1103_v0 }
  0x8f   : > { %v293_v16 = vpop.permute.xlu0 %292  ;;  %v303_v36 = vpop.permute.xlu1 %302 }
  0x93   : > { %v298_v21 = vpop.permute.xlu0 %297  ;;  %v515_v62 = vpop.permute.xlu1 %514 }
  0x97   : > { %v520_v4 = vpop.permute.xlu0 %519 }
  0xee   : > { %v394_v17 = vpop.f32.mrb[0].mxu0  ;;  %v477_v18 = vpop.f32.mrb[0].mxu1 }
  0xef   : > { %v396_v19 = vpop.f32.mrb[1].mxu0  ;;  %v479_v20 = vpop.f32.mrb[1].mxu1  ;;  %v395_v22 = vadd.f32 %v394_v17, %v293_v16  ;;  %v478_v23 = vadd.f32 %v477_v18, %v293_v16 }
  0xf0   : > { %v397_v24 = vadd.f32 %v396_v19, %v293_v16  ;;  %v480_v25 = vadd.f32 %v479_v20, %v293_v16  ;;  %v525_v17 = vpop.permute.xlu1 %524 }
  0xf1   : > { %v494_v34 = vmax.f32 %v395_v22, 0.0  ;;  %v496_v35 = vmax.f32 %v478_v23, 0.0 }
  0xf2   : > { %v400_v26 = vpop.f32.mrb[2].mxu0  ;;  %v483_v27 = vpop.f32.mrb[2].mxu1  ;;  %v495_v39 = vmax.f32 %v397_v24, 0.0  ;;  %v497_v40 = vmax.f32 %v480_v25, 0.0 }
  0xf3   : > { %v401_v28 = vadd.f32 %v400_v26, %v298_v21  ;;  %v484_v29 = vadd.f32 %v483_v27, %v298_v21  ;;  %v402_v30 = vpop.f32.mrb[3].mxu0  ;;  %v485_v31 = vpop.f32.mrb[3].mxu1 }
  0xf4   : > { %v403_v32 = vadd.f32 %v402_v30, %v298_v21  ;;  %v486_v33 = vadd.f32 %v485_v31, %v298_v21 }
  0xf5   : > { %v498_v37 = vmax.f32 %v401_v28, 0.0  ;;  %v500_v38 = vmax.f32 %v484_v29, 0.0 }
  0xf6   : > { %v499_v41 = vmax.f32 %v403_v32, 0.0  ;;  %v501_v42 = vmax.f32 %v486_v33, 0.0  ;;  %v406_v43 = vpop.f32.mrb[4].mxu0  ;;  %v489_v44 = vpop.f32.mrb[4].mxu1 }
  0xf7   : > { %v982_v45 = vpack.c.bf16 %v498_v37, %v494_v34  ;;  %v986_v46 = vpack.c.bf16 %v500_v38, %v496_v35  ;;  %v408_v47 = vpop.f32.mrb[5].mxu0  ;;  %v491_v48 = vpop.f32.mrb[5].mxu1  ;;  %v407_v53 = vadd.f32 %v406_v43, %v303_v36  ;;  %v490_v54 = vadd.f32 %v489_v44, %v303_v36 }
  0xf8   : > { %v980_v49 = vpack.c.bf16 %v499_v41, %v495_v39  ;;  %v984_v50 = vpack.c.bf16 %v501_v42, %v497_v40  ;;  %v409_v51 = vadd.f32 %v408_v47, %v303_v36  ;;  %v492_v52 = vadd.f32 %v491_v48, %v303_v36  ;;  %v715_v41 = vld [vmem:[%s1320_s5] sm:$0x1f]  ;;  %v720_v42 = vpop.permute.xlu0 %719 }
  0xf9   : > { %v502_v57 = vmax.f32 %v407_v53, 0.0  ;;  %v504_v58 = vmax.f32 %v490_v54, 0.0 }
  0xfa   : > { %v503_v55 = vmax.f32 %v409_v51, 0.0  ;;  %v505_v56 = vmax.f32 %v492_v52, 0.0  ;;  %981 = vmatprep.subr.bf16.mxu0 %v980_v49  ;;  %985 = vmatprep.subr.bf16.mxu1 %v984_v50 }
  0xfb   : > { %983 = vmatpush1.bf16.msra.mxu0 %v982_v45  ;;  %987 = vmatpush1.bf16.msra.mxu1 %v986_v46 }
  0xfc   : > { %541 = vmatprep.subr.mxu0 %v503_v55  ;;  %624 = vmatprep.subr.mxu1 %v505_v56 }
  0xff   : > { %542 = vmatpush1.msra.mxu0 %v502_v57  ;;  %625 = vmatpush1.msra.mxu1 %v504_v58 }
 0x100   : > { %966 = vmatmul.mubr.msk.f32.vlgmr.msra.gmra.mrb[6].mxu0 %vm527_vm2, %v506_v59  ;;  %969 = vmatmul.mubr.msk.f32.vlgmr.msra.gmra.mrb[6].mxu1 %vm527_vm2, %v506_v59 }
 0x101   : > { %607 = vmatprep.mubr.f32.mxu0 %v1103_v0  ;;  %690 = vmatprep.mubr.f32.mxu1 %v1103_v0 }
 0x104   : > { %967 = vmatmul.mubr.msk.f32.gmra.mrb[8].mxu0 %vm527_vm2, %v507_v60  ;;  %970 = vmatmul.mubr.msk.f32.gmra.mrb[8].mxu1 %vm527_vm2, %v507_v60 }
 0x105   : > { %613 = vmatprep.mubr.f32.mxu0 %v1103_v0  ;;  %696 = vmatprep.mubr.f32.mxu1 %v1103_v0 }
 0x108   : > { %968 = vmatmul.mubr.msk.f32.gmra.mrb[10].mxu0 %vm527_vm2, %v508_v61  ;;  %971 = vmatmul.mubr.msk.f32.gmra.mrb[10].mxu1 %vm527_vm2, %v508_v61 }
 0x109   : > { %789 = vmatprep.mubr.f32.mxu0 %v1103_v0  ;;  %860 = vmatprep.mubr.f32.mxu1 %v1103_v0 }
 0x1d3   : > { %v603_v63 = vpop.f32.mrb[6].mxu0  ;;  %v686_v1 = vpop.f32.mrb[6].mxu1 }
 0x1d4   : > { %v605_v2 = vpop.f32.mrb[7].mxu0  ;;  %v688_v3 = vpop.f32.mrb[7].mxu1  ;;  %v604_v5 = vadd.f32 %v603_v63, %v515_v62  ;;  %v687_v6 = vadd.f32 %v686_v1, %v515_v62 }
 0x1d5   : > { %v606_v7 = vadd.f32 %v605_v2, %v515_v62  ;;  %v689_v8 = vadd.f32 %v688_v3, %v515_v62 }
 0x1d6   : > { %v703_v0 = vmax.f32 %v604_v5, 0.0  ;;  %v705_v18 = vmax.f32 %v687_v6, 0.0 }
 0x1d7   : > { %v609_v9 = vpop.f32.mrb[8].mxu0  ;;  %v692_v10 = vpop.f32.mrb[8].mxu1  ;;  %v704_v21 = vmax.f32 %v606_v7, 0.0  ;;  %v706_v22 = vmax.f32 %v689_v8, 0.0 }
 0x1d8   : > { %v610_v11 = vadd.f32 %v609_v9, %v520_v4  ;;  %v693_v12 = vadd.f32 %v692_v10, %v520_v4  ;;  %v611_v13 = vpop.f32.mrb[9].mxu0  ;;  %v694_v14 = vpop.f32.mrb[9].mxu1 }
 0x1d9   : > { %v612_v15 = vadd.f32 %v611_v13, %v520_v4  ;;  %v695_v16 = vadd.f32 %v694_v14, %v520_v4 }
 0x1da   : > { %v707_v19 = vmax.f32 %v610_v11, 0.0  ;;  %v709_v20 = vmax.f32 %v693_v12, 0.0 }
 0x1db   : > { %v708_v23 = vmax.f32 %v612_v15, 0.0  ;;  %v710_v24 = vmax.f32 %v695_v16, 0.0  ;;  %v615_v25 = vpop.f32.mrb[10].mxu0  ;;  %v698_v26 = vpop.f32.mrb[10].mxu1 }
 0x1dc   : > { %v990_v27 = vpack.c.bf16 %v707_v19, %v703_v0  ;;  %v994_v28 = vpack.c.bf16 %v709_v20, %v705_v18  ;;  %v617_v29 = vpop.f32.mrb[11].mxu0  ;;  %v700_v30 = vpop.f32.mrb[11].mxu1  ;;  %v616_v35 = vadd.f32 %v615_v25, %v525_v17  ;;  %v699_v36 = vadd.f32 %v698_v26, %v525_v17 }
 0x1dd   : > { %v988_v31 = vpack.c.bf16 %v708_v23, %v704_v21  ;;  %v992_v32 = vpack.c.bf16 %v710_v24, %v706_v22  ;;  %v618_v33 = vadd.f32 %v617_v29, %v525_v17  ;;  %v701_v34 = vadd.f32 %v700_v30, %v525_v17 }
 0x1de   : > { %v711_v39 = vmax.f32 %v616_v35, 0.0  ;;  %v713_v40 = vmax.f32 %v699_v36, 0.0 }
 0x1df   : > { %v712_v37 = vmax.f32 %v618_v33, 0.0  ;;  %v714_v38 = vmax.f32 %v701_v34, 0.0  ;;  %989 = vmatprep.subr.bf16.mxu0 %v988_v31  ;;  %993 = vmatprep.subr.bf16.mxu1 %v992_v32 }
 0x1e0   : > { %991 = vmatpush1.bf16.msra.mxu0 %v990_v27  ;;  %995 = vmatpush1.bf16.msra.mxu1 %v994_v28 }
 0x1e1   : > { %729 = vmatprep.subr.mxu0 %v712_v37  ;;  %800 = vmatprep.subr.mxu1 %v714_v38 }
 0x1e4   : > { %730 = vmatpush1.msra.mxu0 %v711_v39  ;;  %801 = vmatpush1.msra.mxu1 %v713_v40 }
 0x1e5   : > { %972 = vmatmul.mubr.msk.f32.vlgmr.msra.gmra.mrb[12].mxu0 %vm527_vm2, %v715_v41  ;;  %973 = vmatmul.mubr.msk.f32.vlgmr.msra.gmra.mrb[12].mxu1 %vm527_vm2, %v715_v41 }
 0x2b8   : > { %v791_v43 = vpop.f32.mrb[12].mxu0  ;;  %v862_v44 = vpop.f32.mrb[12].mxu1 }
 0x2b9   : > { %v792_v45 = vadd.f32 %v791_v43, %v720_v42  ;;  %v863_v46 = vadd.f32 %v862_v44, %v720_v42  ;;  %v793_v47 = vpop.f32.mrb[13].mxu0  ;;  %v864_v48 = vpop.f32.mrb[13].mxu1 }
 0x2ba   : > { %v794_v49 = vadd.f32 %v793_v47, %v720_v42  ;;  %v865_v50 = vadd.f32 %v864_v48, %v720_v42 }
 0x2bb   : > { %v867_v51 = vmax.f32 %v792_v45, 0.0  ;;  %v869_v52 = vmax.f32 %v863_v46, 0.0 }
 0x2bc   : > { %v868_v53 = vmax.f32 %v794_v49, 0.0  ;;  %v870_v54 = vmax.f32 %v865_v50, 0.0 }
 0x2bd   : > { %871 = vst [vmem:[%s272_s21] sm:$0x1f] %v867_v51  ;;  %873 = vst [vmem:[%s272_s21 + $0x10] sm:$0x1f] %v869_v52 }
 0x2be   : > { %872 = vst [vmem:[%s272_s21 + $0x8] sm:$0x1f] %v868_v53  ;;  %874 = vst [vmem:[%s272_s21 + $0x18] sm:$0x1f] %v870_v54 }
 0x2bf   : > { %1052 = shalt.err (!%p1049_p3)
}
 0x2c0   : > { %s1053_s16 = scalar_lea.hbm %s1273_s8, 512  ;;  %s1057_s19 = scalar_lea.hbm %s1322_s7, 1024 }
 0x2c1   : > { %p1054_p4 = scmp.ne.s32.totalorder %s1273_s8, %s1053_s16  ;;  %p1058_p9 = scmp.lt.u32.totalorder %s1273_s8, %s1322_s7 }
 0x2c2   : > { %p1059_p10 = scmp.lt.u32.totalorder %s1057_s19, %s1053_s16  ;;  %p1061_p12 = scmp.lt.u32.totalorder %s1053_s16, %s1273_s8 }
 0x2c3   : > { %p1055_p7 = pnand %p1054_p4, %p1184_p5 }
 0x2c4   : > { %p1060_p11 = por %p1059_p10, %p1058_p9 }
 0x2c5   : > { %p1056_p8 = pneg %p1055_p7 }
 0x2c6   : > { %p1062_p13 = por %p1061_p12, %p1060_p11 }
 0x2c8   : > { %p1063_p0 = pnand %p1062_p13, %p1056_p8 }
 0x2ca   : > { %1066 = shalt.err (!%p1063_p0)
}
 0x2cb   : > { %996 = dma.vmem_to_hbm [thread:$0]  (%p1184_p5), %s1275_s22, 512, %s1273_s8, %s876_s28  }
 0x2cc PF: > { %p1002_p1 = scmp.ge.s32.totalorder %s1101_s27, 2  ;;  %s902_s23 = sand.u32 1, %s1089_s24  }
 0x2cd   : > { %s903_s29 = scalar_lea.sflag [#allocation3], %s902_s23 }
 0x2ce   : > { %p999_p2 = pnand %p1002_p1, %p1188_p6 }
 0x2d0   : > { %1084 = dma.done.wait (!%p999_p2), %s903_s29, 512  }
 0x2d1   : > { %1086 = vsyncadd (!%p999_p2), %s903_s29, 4294966784  ;;  %p17_p3 = scmp.ge.s32.totalorder %s1171_s30, 4   ;;  %s1325_s24 = smov %s1093_s25 }
 0x2d2   : > { %s1326_s25 = smov %s1097_s26  ;;  %s1327_s26 = smov %s1182_s10 }
 0x2d3   : > { %s1328_s27 = smov %s1171_s30  ;;  %19 = sbr.rel (!%p17_p3) target bundleno = 3 (0x3), region = 83 }
 0x2da   :  { %908 = vsyncpa [#allocation3], 1 }
 0x2db   :  { %910 = vsyncpa [#allocation3 + $0x1], 1 }

</bundles_post_ra>
